<compile_context>
chip_gen: v5e
topology: v5e:2x2
jax: 0.10.0
libtpu: 0.0.40
codegen_flags: <defaults>
</compile_context>

<pallas_src>
import jax
import jax.numpy as jnp
from jax.experimental import pallas as pl
from jax.experimental.pallas import tpu as pltpu


def _conv1x1_relu_kernel(x_ref, w_ref, b_ref, o_ref):
    # x_ref: (nb, Cin, tm)  w_ref: (Cout, Cin)  b_ref: (Cout, 1)  o_ref: (nb, Cout, tm)
    w = w_ref[...]
    b = b_ref[...]                            # f32 (Cout, 1), broadcasts over lanes
    for i in range(x_ref.shape[0]):           # static unroll over the batch block
        y = jnp.dot(w, x_ref[i], preferred_element_type=jnp.float32)
        o_ref[i] = jnp.maximum(y + b, 0.0).astype(o_ref.dtype)


def _choose_tiles(N, Cin, Cout, M_pad, itemsize,
                  vmem_budget_bytes=16 << 20,    # double-buffered in+out tiles
                  target_payload_bytes=1 << 20,  # aim for >=1 MiB streamed / step
                  max_tm=32768, max_nb=8):
    """Pick (nb, tm) so nb | N, tm | M_pad, tm % 128 == 0, tiles fit VMEM."""
    pad8 = lambda c: ((max(c, 1) + 7) // 8) * 8
    bytes_per_col = itemsize * (pad8(Cin) + pad8(Cout))
    max_cols = max(128, vmem_budget_bytes // (2 * bytes_per_col))

    # tm: largest 128-multiple divisor of M_pad within the caps -> every grid
    # step's store is unmasked (lane-dense) and there is no tail block.
    cap = min(max_tm, max_cols, M_pad)
    q = M_pad // 128
    tm = 128
    for d in range(1, q + 1):
        if q % d == 0 and 128 * d <= cap:
            tm = 128 * d
    m_steps = M_pad // tm

    # nb: block over batch until the per-step payload is big enough, keeping
    # >=4 grid steps whenever the problem is big enough to have them
    # (v7x shards 'parallel' grid axes across its 2 TensorCores).
    nb = 1
    total_steps_unblocked = N * m_steps
    for cand in range(1, N + 1):
        if cand > max_nb:
            break
        if N % cand != 0:
            continue
        if cand * tm > max_cols:
            break
        steps = (N // cand) * m_steps
        if steps < 4 and total_steps_unblocked >= 4:
            break
        nb = cand
        if cand * tm * bytes_per_col >= target_payload_bytes:
            break
    return nb, tm


def conv1x1_relu_pallas(x_ncm, w, b_col, *, io_dtype=None):
    """x_ncm: (N, Cin, M), w: (Cout, Cin), b_col: (Cout, 1) f32
    -> (N, Cout, M) = relu(w @ x + b), in io_dtype (default: x's dtype)."""
    N, Cin, M = x_ncm.shape
    Cout = w.shape[0]
    if io_dtype is None:
        io_dtype = x_ncm.dtype
    io_dtype = jnp.dtype(io_dtype)
    itemsize = io_dtype.itemsize

    # Keep the lane (last) dim 128-aligned so every store is an unmasked vst.
    M_pad = ((M + 127) // 128) * 128
    x_in = x_ncm.astype(io_dtype)
    if M_pad != M:
        x_in = jnp.pad(x_in, ((0, 0), (0, 0), (0, M_pad - M)))

    nb, tm = _choose_tiles(N, Cin, Cout, M_pad, itemsize)
    grid = (N // nb, M_pad // tm)

    cost = pl.CostEstimate(
        flops=2 * N * M_pad * Cin * Cout,
        transcendentals=0,
        bytes_accessed=itemsize * N * M_pad * (Cin + Cout)
        + itemsize * Cin * Cout + 4 * Cout,
    )

    out = pl.pallas_call(
        _conv1x1_relu_kernel,
        out_shape=jax.ShapeDtypeStruct((N, Cout, M_pad), io_dtype),
        grid_spec=pltpu.PrefetchScalarGridSpec(
            num_scalar_prefetch=0,
            grid=grid,
            in_specs=[
                # Input tile: (nb, Cin, tm) — Cin on sublanes, M on lanes.
                pl.BlockSpec((nb, Cin, tm), lambda n, m: (n, 0, m)),
                # Tiny weight / bias stay VMEM-resident (constant index_map).
                pl.BlockSpec((Cout, Cin), lambda n, m: (0, 0)),
                pl.BlockSpec((Cout, 1), lambda n, m: (0, 0)),
            ],
            out_specs=pl.BlockSpec((nb, Cout, tm), lambda n, m: (n, 0, m)),
        ),
        compiler_params=pltpu.CompilerParams(
            dimension_semantics=("parallel", "parallel"),
            # 32 MiB is safe on every generation (v7x physical VMEM is 64 MiB,
            # v5e's default scoped limit of 16 MiB is raised for big tiles).
            vmem_limit_bytes=32 * 1024 * 1024,
        ),
        cost_estimate=cost,
    )(x_in, w.astype(io_dtype), b_col.astype(jnp.float32))

    if M_pad != M:
        out = out[:, :, :M]
    return out


class STGCN:
    """JAX/Pallas port of the PyTorch STGCN module (1x1 Conv2d + ReLU)."""

    def __init__(self, in_channels, out_channels, key):
        k_w, k_b = jax.random.split(key)
        # Deterministic init mimicking nn.Conv2d default (kaiming-uniform-ish).
        bound = 1.0 / (in_channels ** 0.5)
        # PyTorch conv weight shape: (out_channels, in_channels, 1, 1)
        self.weight = jax.random.uniform(
            k_w, (out_channels, in_channels, 1, 1),
            minval=-bound, maxval=bound, dtype=jnp.float32)
        self.bias = jax.random.uniform(
            k_b, (out_channels,), minval=-bound, maxval=bound,
            dtype=jnp.float32)
        self.in_channels = in_channels
        self.out_channels = out_channels
        # Matmul-layout weight/bias materialized once (no per-call transpose).
        self.w_mat = self.weight[:, :, 0, 0]              # (Cout, Cin)
        self.b_col = self.bias.reshape(out_channels, 1)   # (Cout, 1)

    def __call__(self, x, io_dtype=None):
        # x: (N, Cin, H, W) float32  (NCHW, matching the PyTorch module)
        N, Cin, H, W = x.shape
        assert Cin == self.in_channels
        Cout = self.out_channels

        # NCHW -> (N, Cin, H*W): contiguous-dim merge, no data movement.
        x_ncm = x.reshape(N, Cin, H * W)
        y_ncm = conv1x1_relu_pallas(x_ncm, self.w_mat, self.b_col,
                                    io_dtype=io_dtype)
        # (N, Cout, H*W) -> NCHW: again just a reshape.
        return y_ncm.reshape(N, Cout, H, W)


def _reference(x, weight, bias):
    # Pure-JAX reference of ReLU(Conv2d 1x1).
    y = jnp.einsum("nchw,oc->nohw", x, weight[:, :, 0, 0]) + bias[None, :, None, None]
    return jnp.maximum(y, 0.0)


if __name__ == "__main__":
    key = jax.random.PRNGKey(0)
    k_x, k_m = jax.random.split(key)

    N, C_in, H, W = 2, 4, 16, 16
    C_out = 8
    x = jax.random.normal(k_x, (N, C_in, H, W), dtype=jnp.float32)

    model = STGCN(C_in, C_out, k_m)
    ref = _reference(x, model.weight, model.bias)

    # f32 path (exact parity with the PyTorch module).
    out = jax.block_until_ready(model(x))
    assert out.shape == (N, C_out, H, W)
    assert out.dtype == jnp.float32
    assert jnp.allclose(out, ref, atol=1e-5, rtol=1e-5), "f32 mismatch vs reference"

    # bf16 I/O path (halves HBM traffic; accumulation stays f32).
    out_bf16 = jax.block_until_ready(model(x, io_dtype=jnp.bfloat16))
    assert out_bf16.dtype == jnp.bfloat16
    assert jnp.allclose(out_bf16.astype(jnp.float32), ref, atol=1e-1, rtol=1e-1), \
        "bf16 mismatch vs reference"

    print("KERNEL_OK")
</pallas_src>

<mosaic_0001>
module attributes {stable_mosaic.version = 11 : i64} {
  func.func @_conv1x1_relu_kernel(%arg0: i32, %arg1: i32, %arg2: memref<2x4x256xf32, #tpu.memory_space<vmem>>, %arg3: memref<8x4xf32, #tpu.memory_space<vmem>>, %arg4: memref<8x1xf32, #tpu.memory_space<vmem>>, %arg5: memref<2x8x256xf32, #tpu.memory_space<vmem>>) attributes {dimension_semantics = [#tpu.dimension_semantics<parallel>, #tpu.dimension_semantics<parallel>], iteration_bounds = array<i64: 1, 1>, scalar_prefetch = 0 : i64, scratch_operands = 0 : i64, tpu.core_type = #tpu.core_type<tc>, window_params = [{transform_indices = @transform_0, window_bounds = array<i64: 2, 4, 256>}, {pipeline_mode = #tpu.pipeline_mode<synchronous>, transform_indices = @transform_1, window_bounds = array<i64: 8, 4>}, {pipeline_mode = #tpu.pipeline_mode<synchronous>, transform_indices = @transform_2, window_bounds = array<i64: 8, 1>}, {transform_indices = @transform_3, window_bounds = array<i64: 2, 8, 256>}]} {
    %c0 = arith.constant 0 : index
    %c0_0 = arith.constant 0 : index
    %0 = vector.load %arg3[%c0, %c0_0] : memref<8x4xf32, #tpu.memory_space<vmem>>, vector<8x4xf32>
    %c0_1 = arith.constant 0 : index
    %c0_2 = arith.constant 0 : index
    %1 = vector.load %arg4[%c0_1, %c0_2] : memref<8x1xf32, #tpu.memory_space<vmem>>, vector<8x1xf32>
    %c0_3 = arith.constant 0 : index
    %c0_4 = arith.constant 0 : index
    %c0_5 = arith.constant 0 : index
    %2 = vector.load %arg2[%c0_3, %c0_4, %c0_5] : memref<2x4x256xf32, #tpu.memory_space<vmem>>, vector<1x4x256xf32>
    %3 = vector.shape_cast %2 : vector<1x4x256xf32> to vector<4x256xf32>
    %cst = arith.constant dense<0.000000e+00> : vector<8x256xf32>
    %4 = tpu.matmul %0, %3, %cst {dimension_numbers = #tpu.dot_dimension_numbers<[1], [0], [0], [1], [0, 0, 1, 1], [], []>} : vector<8x4xf32>, vector<4x256xf32>, vector<8x256xf32> -> vector<8x256xf32>
    %5 = vector.broadcast %1 : vector<8x1xf32> to vector<8x256xf32>
    %6 = arith.addf %4, %5 : vector<8x256xf32>
    %cst_6 = arith.constant 0.000000e+00 : f32
    %7 = vector.broadcast %cst_6 : f32 to vector<8x256xf32>
    %8 = arith.maximumf %6, %7 : vector<8x256xf32>
    %c0_7 = arith.constant 0 : index
    %c0_8 = arith.constant 0 : index
    %c0_9 = arith.constant 0 : index
    %9 = vector.load %arg5[%c0_7, %c0_8, %c0_9] : memref<2x8x256xf32, #tpu.memory_space<vmem>>, vector<1x8x256xf32>
    %10 = vector.shape_cast %9 : vector<1x8x256xf32> to vector<8x256xf32>
    %11 = vector.shape_cast %8 : vector<8x256xf32> to vector<1x8x256xf32>
    tpu.vector_store %arg5[%c0_7, %c0_8, %c0_9], %11 {strides = array<i32>} : memref<2x8x256xf32, #tpu.memory_space<vmem>>, vector<1x8x256xf32>,
    %c1 = arith.constant 1 : index
    %c0_10 = arith.constant 0 : index
    %c0_11 = arith.constant 0 : index
    %12 = vector.load %arg2[%c1, %c0_10, %c0_11] : memref<2x4x256xf32, #tpu.memory_space<vmem>>, vector<1x4x256xf32>
    %13 = vector.shape_cast %12 : vector<1x4x256xf32> to vector<4x256xf32>
    %cst_12 = arith.constant dense<0.000000e+00> : vector<8x256xf32>
    %14 = tpu.matmul %0, %13, %cst_12 {dimension_numbers = #tpu.dot_dimension_numbers<[1], [0], [0], [1], [0, 0, 1, 1], [], []>} : vector<8x4xf32>, vector<4x256xf32>, vector<8x256xf32> -> vector<8x256xf32>
    %15 = vector.broadcast %1 : vector<8x1xf32> to vector<8x256xf32>
    %16 = arith.addf %14, %15 : vector<8x256xf32>
    %cst_13 = arith.constant 0.000000e+00 : f32
    %17 = vector.broadcast %cst_13 : f32 to vector<8x256xf32>
    %18 = arith.maximumf %16, %17 : vector<8x256xf32>
    %c1_14 = arith.constant 1 : index
    %c0_15 = arith.constant 0 : index
    %c0_16 = arith.constant 0 : index
    %19 = vector.load %arg5[%c1_14, %c0_15, %c0_16] : memref<2x8x256xf32, #tpu.memory_space<vmem>>, vector<1x8x256xf32>
    %20 = vector.shape_cast %19 : vector<1x8x256xf32> to vector<8x256xf32>
    %21 = vector.shape_cast %18 : vector<8x256xf32> to vector<1x8x256xf32>
    tpu.vector_store %arg5[%c1_14, %c0_15, %c0_16], %21 {strides = array<i32>} : memref<2x8x256xf32, #tpu.memory_space<vmem>>, vector<1x8x256xf32>,
    return
  }
  func.func @transform_0(%arg0: i32, %arg1: i32) -> (i32, i32, i32) {
    %c0_i32 = arith.constant 0 : i32
    %c0_i32_0 = arith.constant 0 : i32
    return %arg0, %c0_i32, %arg1 : i32, i32, i32
  }
  func.func @transform_1(%arg0: i32, %arg1: i32) -> (i32, i32) {
    %c0_i32 = arith.constant 0 : i32
    %c0_i32_0 = arith.constant 0 : i32
    %c0_i32_1 = arith.constant 0 : i32
    return %c0_i32, %c0_i32_0 : i32, i32
  }
  func.func @transform_2(%arg0: i32, %arg1: i32) -> (i32, i32) {
    %c0_i32 = arith.constant 0 : i32
    %c0_i32_0 = arith.constant 0 : i32
    %c0_i32_1 = arith.constant 0 : i32
    return %c0_i32, %c0_i32_0 : i32, i32
  }
  func.func @transform_3(%arg0: i32, %arg1: i32) -> (i32, i32, i32) {
    %c0_i32 = arith.constant 0 : i32
    %c0_i32_0 = arith.constant 0 : i32
    return %arg0, %c0_i32, %arg1 : i32, i32, i32
  }
}

</mosaic_0001>

<bundles_post_ra>
// kernel: tpu_custom_call.1
= control target key start
LH: loop header
LB: loop body
LE: loop exit
PB: predicated region body
PF: predicated region fallthrough
CT: control target
= control target key end

     0   :  { %v193_v1 = vmov 0   ;;  %s232_s0 = inlined_call_operand.vmem [shape: f32[2,4,256], index: 0, kind: input, shape index: {}]   ;;  %s233_s1 = inlined_call_operand.vmem [shape: f32[8,4], index: 1, kind: input, shape index: {}]   ;;  %s234_s2 = inlined_call_operand.vmem [shape: f32[8,1], index: 2, kind: input, shape index: {}]   ;;  %s235_s3 = inlined_call_operand.hbm [shape: f32[2,8,256], index: 3, kind: output, shape index: {}]  }
   0x1   :  { %v17_v0 = vld [vmem:[%s232_s0] sm:$0xff]  ;;  %166 = vset.pattern.permute.xlu0 %v193_v1 }
   0x2   :  { %24 = vst [vmem:[#allocation1] ss:$2 sm:$0xff] %v17_v0  ;;  %v16_v2 = vld [vmem:[%s234_s2] sm:$0xff] }
   0x3   :  { %8 = vsyncpa [#allocation3], 0  ;;  %20 = vperm.xlu0 %166, %v16_v2   ;;  %v157_v3 = vld [vmem:[%s232_s0 + $0x8] sm:$0xff]  ;;  %vm31_vm0 = vcmask 1043456   ;;  %v15_v6 = vld [vmem:[%s233_s1] sm:$0xff]  ;;  %vm27_vm1 = vcmask 31744  }
   0x4   :  { %s194_s0 = smov [#allocation2]   ;;  %s141_s21 = sshll.u32 %s235_s3, 4  ;;  %s142_s21 = int_to_ptr.hbm [resolvable:$true] %s141_s21 }
   0x5   :  { %s139_s1 = sshll.u32 %s194_s0, 4  ;;  %s195_s22 = smov 256   ;;  %s140_s1 = int_to_ptr.vmem [resolvable:$true] %s139_s1 }
   0x6   :  { %s196_s23 = smov 16  }
   0x9   :  { %v25_v4 = vld.sshfl [vmem:[#allocation1] sm:$0xff pattern:$0x75316420]  ;;  %v26_v5 = vld.sshfl [vmem:[#allocation1 + $0x8] sm:$0xff pattern:$0x75316420] }
   0xa   :  { %83 = vst [vmem:[#allocation1] ss:$2 sm:$0xff] %v157_v3  ;;  %153 = vmatpush.msk.msra.mxu0 %vm31_vm0, %v25_v4  ;;  %155 = vmatpush.msk.msra.mxu1 %vm31_vm0, %v26_v5 }
   0xb   :  { %154 = vmatmul.msk.f32.vlgmr.msra.gmra.mxu0 %vm27_vm1, %v15_v6  ;;  %156 = vmatmul.msk.f32.vlgmr.msra.gmra.mxu1 %vm27_vm1, %v15_v6 }
  0x11   :  { %v84_v7 = vld.sshfl [vmem:[#allocation1] sm:$0xff pattern:$0x75316420]  ;;  %v85_v8 = vld.sshfl [vmem:[#allocation1 + $0x8] sm:$0xff pattern:$0x75316420] }
  0x12   :  { %158 = vmatpush.msk.msra.mxu2 %vm31_vm0, %v84_v7  ;;  %160 = vmatpush.msk.msra.mxu3 %vm31_vm0, %v85_v8 }
  0x13   :  { %159 = vmatmul.msk.f32.vlgmr.msra.gmra.mxu2 %vm27_vm1, %v15_v6  ;;  %161 = vmatmul.msk.f32.vlgmr.msra.gmra.mxu3 %vm27_vm1, %v15_v6 }
  0x75   :  { %v21_v9 = vpop.permute.xlu0 %20 }
  0x88   :  { %v53_v10 = vpop.f32.mrf.mxu0  ;;  %v73_v11 = vpop.f32.mrf.mxu1 }
  0x89   :  { %v54_v12 = vadd.f32 %v53_v10, %v21_v9  ;;  %v74_v13 = vadd.f32 %v73_v11, %v21_v9 }
  0x8b   :  { %v76_v14 = vmax.f32 %v54_v12, 0.0  ;;  %v77_v15 = vmax.f32 %v74_v13, 0.0 }
  0x8d   :  { %78 = vst [vmem:[#allocation2] sm:$0xff] %v76_v14 }
  0x8e   :  { %79 = vst [vmem:[#allocation2 + $0x8] sm:$0xff] %v77_v15 }
  0x96   :  { %v107_v16 = vpop.f32.mrf.mxu2  ;;  %v127_v17 = vpop.f32.mrf.mxu3 }
  0x97   :  { %v108_v18 = vadd.f32 %v107_v16, %v21_v9  ;;  %v128_v19 = vadd.f32 %v127_v17, %v21_v9 }
  0x99   :  { %v130_v20 = vmax.f32 %v108_v18, 0.0  ;;  %v131_v21 = vmax.f32 %v128_v19, 0.0 }
  0x9b   :  { %133 = vst [vmem:[#allocation2 + $0x10] sm:$0xff] %v130_v20 }
  0x9c   :  { %134 = vst [vmem:[#allocation2 + $0x18] sm:$0xff] %v131_v21 }
  0x9d   :  { %147 = dma.vmem_to_hbm [thread:$0]  %s140_s1, 512, %s142_s21, [#allocation3], %s195_s22, %s195_s22, %s196_s23  }
  0x9e   :  { %191 = dma.done.wait [#allocation3], 512  }
  0x9f   :  { %192 = vsyncadd [#allocation3], 4294966784 }
  0xa0   :  { %152 = vsyncpa [#allocation3], 1 }

</bundles_post_ra>
